<compile_context>
chip_gen: v7x
topology: tpu7x:2x2x1
jax: 0.10.0
libtpu: 0.0.40
codegen_flags: <defaults>
</compile_context>

<pallas_src>
import functools

import jax
import jax.numpy as jnp
from jax.experimental import pallas as pl
from jax.experimental.pallas import tpu as pltpu


def _sobel_kernel(x_ref, ox_ref, oy_ref, *, h, w):
    # x_ref / ox_ref / oy_ref: (nb, h*w) -- nb images, each flattened row-major
    # so the whole image lives on the (lane-dense) last axis.
    x = x_ref[...]
    nb, hw = x.shape
    dt = x.dtype

    # Edge masks, built once per block from a 2-D iota (1-D iota is not
    # supported on TPU).  lane k <-> pixel (i = k // w, j = k % w).
    lane = jax.lax.broadcasted_iota(jnp.int32, (1, hw), 1)
    col = lane % w
    has_l = col != 0              # (i, j-1) inside the image
    has_r = col != (w - 1)        # (i, j+1) inside the image
    has_u = lane >= w             # (i-1, j) inside the image  (row != 0)
    has_d = lane < (h - 1) * w    # (i+1, j) inside the image  (row != h-1)

    zero = jnp.zeros((), dt)

    def shifted(a, k, mask):
        # value of `a` at flattened offset -k (k=+1: left neighbour, k=+w: row
        # above, ...), zero outside the image.  pltpu.roll follows np.roll
        # semantics (out[p] = a[p - k]); wrap-around only happens at image
        # seams, which `mask` zeroes out.  Rolls go to the XLU slot, selects to
        # the VPU -- nothing is materialized in VMEM.
        return jnp.where(mask, pltpu.roll(a, k % hw, axis=1), zero)

    x_l = shifted(x, 1, has_l)     # x[i, j-1]
    x_r = shifted(x, -1, has_r)    # x[i, j+1]
    x_u = shifted(x, w, has_u)     # x[i-1, j]
    x_d = shifted(x, -w, has_d)    # x[i+1, j]

    x2 = x + x                     # shared by both smooths (no 2.0*x twice)
    v = x_u + x2 + x_d             # vertical   [1,2,1]^T smooth
    s = x_l + x2 + x_r             # horizontal [1,2,1]   smooth

    # Separable Sobel (cross-correlation, exactly F.conv2d with padding=1):
    #   gx[i,j] = v[i, j+1] - v[i, j-1]
    #   gy[i,j] = s[i-1, j] - s[i+1, j]
    gx = shifted(v, -1, has_r) - shifted(v, 1, has_l)
    gy = shifted(s, w, has_u) - shifted(s, -w, has_d)

    ox_ref[...] = jnp.abs(gx).astype(ox_ref.dtype)
    oy_ref[...] = jnp.abs(gy).astype(oy_ref.dtype)


def _vmem_capacity_bytes():
    try:
        return int(pltpu.get_tpu_info().vmem_capacity_bytes)
    except Exception:
        return 64 * 2**20  # conservative fallback: v7x per-TensorCore VMEM


def _pick_batch_fold(n, image_bytes, target_block_bytes,
                     min_split_bytes=512 * 1024):
    """How many whole images to fold into one grid block.

    Largest divisor of n that fits the per-block byte budget; if that folds
    everything into a single program, split into >= 2 programs only when each
    program would still move >= min_split_bytes (two tiny programs are pure
    per-step + DMA-latency overhead, while >= 2 decent-sized programs give
    pipelining and v7x megacore sharding)."""
    divs = [d for d in range(1, n + 1) if n % d == 0]
    fits = [d for d in divs if d * image_bytes <= target_block_bytes] or [1]
    nb = max(fits)
    if nb == n and n >= 2:
        split = [d for d in fits
                 if d <= n // 2 and d * image_bytes >= min_split_bytes]
        if split:
            nb = max(split)
    return nb


def sobelxy(x, *, target_block_bytes=None):
    """x: [N, 1, H, W] (NCHW, single channel) -> (|sobel_x|, |sobel_y|)."""
    N, C, H, W = x.shape
    assert C == 1, "Sobelxy expects a single input channel (weight is [1,1,3,3])"
    HW = H * W
    itemsize = jnp.dtype(x.dtype).itemsize
    image_bytes = HW * itemsize

    # Per-generation budgets: 128 MiB VMEM on v5e/v6e -> bigger blocks, 64 MiB
    # on v7x -> tighter blocks (the grid split then feeds both TensorCores).
    vmem_hi = (_vmem_capacity_bytes() * 3) // 4
    if target_block_bytes is None:
        target_block_bytes = max(1 << 20, (vmem_hi - (4 << 20)) // 12)

    nb = _pick_batch_fold(N, image_bytes, target_block_bytes)
    G = N // nb
    block_bytes = nb * image_bytes
    # Real per-step footprint: (1 input + 2 output) streams double-buffered,
    # plus compiler-managed temps for the rolled/masked intermediates.
    vmem_limit = int(min(vmem_hi, max(32 << 20, 12 * block_bytes + (4 << 20))))

    # TODO(synk): a single image larger than the block budget still runs as one
    # block (no pipelining; may exceed v7x's 64 MiB VMEM).  Add a row-tiled
    # grid axis with a 1-row halo (overlapping row windows) for that case.

    # Free, contiguous reshape (metadata only -- no extra HBM pass): each image
    # becomes one lane-dense row of H*W elements.
    x_flat = x.reshape(G, nb, HW)

    kernel = functools.partial(_sobel_kernel, h=H, w=W)

    grid_spec = pltpu.PrefetchScalarGridSpec(
        num_scalar_prefetch=0,
        grid=(G,),
        in_specs=[pl.BlockSpec((None, nb, HW), lambda g: (g, 0, 0))],
        out_specs=[
            pl.BlockSpec((None, nb, HW), lambda g: (g, 0, 0)),
            pl.BlockSpec((None, nb, HW), lambda g: (g, 0, 0)),
        ],
    )

    ox, oy = pl.pallas_call(
        kernel,
        out_shape=(
            jax.ShapeDtypeStruct((G, nb, HW), x.dtype),
            jax.ShapeDtypeStruct((G, nb, HW), x.dtype),
        ),
        grid_spec=grid_spec,
        compiler_params=pltpu.CompilerParams(
            dimension_semantics=("parallel",),
            vmem_limit_bytes=vmem_limit,
        ),
    )(x_flat)

    # Free reshapes back to NCHW.
    return ox.reshape(N, 1, H, W), oy.reshape(N, 1, H, W)


def _reference(x):
    """Pure-JAX reference matching F.conv2d(x, w, padding=1) + abs."""
    kx = jnp.array([[-1., 0., 1.], [-2., 0., 2.], [-1., 0., 1.]], jnp.float32)
    ky = jnp.array([[1., 2., 1.], [0., 0., 0.], [-1., -2., -1.]], jnp.float32)
    wx = kx[None, None]                                   # OIHW
    wy = ky[None, None]
    dn = jax.lax.conv_dimension_numbers(x.shape, wx.shape,
                                        ("NCHW", "OIHW", "NCHW"))
    sx = jax.lax.conv_general_dilated(x, wx, (1, 1), ((1, 1), (1, 1)),
                                      dimension_numbers=dn)
    sy = jax.lax.conv_general_dilated(x, wy, (1, 1), ((1, 1), (1, 1)),
                                      dimension_numbers=dn)
    return jnp.abs(sx), jnp.abs(sy)


if __name__ == "__main__":
    key = jax.random.PRNGKey(0)

    # Case 1: small batch -- everything folds into a single grid program.
    x1 = jax.random.normal(key, (2, 1, 16, 16), dtype=jnp.float32)
    ox1, oy1 = sobelxy(x1)
    jax.block_until_ready((ox1, oy1))
    rx1, ry1 = _reference(x1)
    assert ox1.shape == (2, 1, 16, 16) and oy1.shape == (2, 1, 16, 16)
    assert jnp.allclose(ox1, rx1, atol=1e-5), "sobel_x mismatch"
    assert jnp.allclose(oy1, ry1, atol=1e-5), "sobel_y mismatch"

    # Case 2: force a small block budget so the batch is tiled over a grid of
    # several pipelined programs (exercises the G > 1 path).
    x2 = jax.random.normal(jax.random.PRNGKey(1), (8, 1, 16, 16),
                           dtype=jnp.float32)
    ox2, oy2 = sobelxy(x2, target_block_bytes=2 * 16 * 16 * 4)
    jax.block_until_ready((ox2, oy2))
    rx2, ry2 = _reference(x2)
    assert jnp.allclose(ox2, rx2, atol=1e-5), "sobel_x mismatch (tiled grid)"
    assert jnp.allclose(oy2, ry2, atol=1e-5), "sobel_y mismatch (tiled grid)"

    # Case 3: non-square image (checks the row/col edge masks and lane rolls).
    x3 = jax.random.normal(jax.random.PRNGKey(2), (3, 1, 16, 24),
                           dtype=jnp.float32)
    ox3, oy3 = sobelxy(x3)
    jax.block_until_ready((ox3, oy3))
    rx3, ry3 = _reference(x3)
    assert jnp.allclose(ox3, rx3, atol=1e-5), "sobel_x mismatch (non-square)"
    assert jnp.allclose(oy3, ry3, atol=1e-5), "sobel_y mismatch (non-square)"

    print("KERNEL_OK")
</pallas_src>

<mosaic_0001>
module attributes {stable_mosaic.version = 11 : i64} {
  func.func @_sobel_kernel(%arg0: i32, %arg1: memref<1x2x256xf32, #tpu.memory_space<vmem>>, %arg2: memref<1x2x256xf32, #tpu.memory_space<vmem>>, %arg3: memref<1x2x256xf32, #tpu.memory_space<vmem>>) attributes {dimension_semantics = [#tpu.dimension_semantics<parallel>], iteration_bounds = array<i64: 1>, scalar_prefetch = 0 : i64, scratch_operands = 0 : i64, tpu.core_type = #tpu.core_type<tc>, window_params = [{transform_indices = @transform_0, window_bounds = array<i64: 1, 2, 256>}, {transform_indices = @transform_1, window_bounds = array<i64: 1, 2, 256>}, {transform_indices = @transform_2, window_bounds = array<i64: 1, 2, 256>}]} {
    %c0 = arith.constant 0 : index
    %c0_0 = arith.constant 0 : index
    %c0_1 = arith.constant 0 : index
    %0 = vector.load %arg1[%c0, %c0_0, %c0_1] : memref<1x2x256xf32, #tpu.memory_space<vmem>>, vector<1x2x256xf32>
    %1 = vector.shape_cast %0 : vector<1x2x256xf32> to vector<2x256xf32>
    %2 = tpu.iota {dimensions = array<i32: 1>} : vector<1x256xi32>
    %c16_i32 = arith.constant 16 : i32
    %c0_i32 = arith.constant 0 : i32
    %3 = arith.cmpi eq, %c16_i32, %c0_i32 : i32
    %c1_i32 = arith.constant 1 : i32
    %4 = arith.select %3, %c1_i32, %c16_i32 : i32
    %5 = vector.broadcast %4 : i32 to vector<1x256xi32>
    %6 = arith.remsi %2, %5 : vector<1x256xi32>
    %c0_i32_2 = arith.constant 0 : i32
    %7 = vector.broadcast %c0_i32_2 : i32 to vector<1x256xi32>
    %8 = arith.cmpi ne, %6, %7 : vector<1x256xi32>
    %c0_i32_3 = arith.constant 0 : i32
    %9 = vector.broadcast %c0_i32_3 : i32 to vector<1x256xi32>
    %10 = arith.cmpi slt, %6, %9 : vector<1x256xi32>
    %c0_i32_4 = arith.constant 0 : i32
    %11 = arith.cmpi slt, %4, %c0_i32_4 : i32
    %12 = vector.broadcast %11 : i1 to vector<1x256xi1>
    %13 = vector.broadcast %12 : vector<1x256xi1> to vector<1x256xi1>
    %14 = arith.xori %10, %13 : vector<1x256xi1>
    %15 = arith.andi %14, %8 : vector<1x256xi1>
    %16 = vector.broadcast %4 : i32 to vector<1x256xi32>
    %17 = arith.addi %6, %16 : vector<1x256xi32>
    %18 = arith.select %15, %17, %6 : vector<1x256xi1>, vector<1x256xi32>
    %c0_i32_5 = arith.constant 0 : i32
    %19 = vector.broadcast %c0_i32_5 : i32 to vector<1x256xi32>
    %20 = arith.cmpi ne, %18, %19 : vector<1x256xi32>
    %c15_i32 = arith.constant 15 : i32
    %21 = vector.broadcast %c15_i32 : i32 to vector<1x256xi32>
    %22 = arith.cmpi ne, %18, %21 : vector<1x256xi32>
    %c16_i32_6 = arith.constant 16 : i32
    %23 = vector.broadcast %c16_i32_6 : i32 to vector<1x256xi32>
    %24 = arith.cmpi sge, %2, %23 : vector<1x256xi32>
    %c240_i32 = arith.constant 240 : i32
    %25 = vector.broadcast %c240_i32 : i32 to vector<1x256xi32>
    %26 = arith.cmpi slt, %2, %25 : vector<1x256xi32>
    %c1_i32_7 = arith.constant 1 : i32
    %27 = tpu.dynamic_rotate %1 by %c1_i32_7 dim 1 : vector<2x256xf32>, i32 -> vector<2x256xf32>
    %cst = arith.constant 0.000000e+00 : f32
    %28 = vector.shape_cast %20 : vector<1x256xi1> to vector<1x256xi1>
    %29 = vector.broadcast %28 : vector<1x256xi1> to vector<2x256xi1>
    %30 = vector.broadcast %cst : f32 to vector<2x256xf32>
    %31 = arith.select %29, %27, %30 : vector<2x256xi1>, vector<2x256xf32>
    %c255_i32 = arith.constant 255 : i32
    %32 = tpu.dynamic_rotate %1 by %c255_i32 dim 1 : vector<2x256xf32>, i32 -> vector<2x256xf32>
    %cst_8 = arith.constant 0.000000e+00 : f32
    %33 = vector.shape_cast %22 : vector<1x256xi1> to vector<1x256xi1>
    %34 = vector.broadcast %33 : vector<1x256xi1> to vector<2x256xi1>
    %35 = vector.broadcast %cst_8 : f32 to vector<2x256xf32>
    %36 = arith.select %34, %32, %35 : vector<2x256xi1>, vector<2x256xf32>
    %c16_i32_9 = arith.constant 16 : i32
    %37 = tpu.dynamic_rotate %1 by %c16_i32_9 dim 1 : vector<2x256xf32>, i32 -> vector<2x256xf32>
    %cst_10 = arith.constant 0.000000e+00 : f32
    %38 = vector.shape_cast %24 : vector<1x256xi1> to vector<1x256xi1>
    %39 = vector.broadcast %38 : vector<1x256xi1> to vector<2x256xi1>
    %40 = vector.broadcast %cst_10 : f32 to vector<2x256xf32>
    %41 = arith.select %39, %37, %40 : vector<2x256xi1>, vector<2x256xf32>
    %c240_i32_11 = arith.constant 240 : i32
    %42 = tpu.dynamic_rotate %1 by %c240_i32_11 dim 1 : vector<2x256xf32>, i32 -> vector<2x256xf32>
    %cst_12 = arith.constant 0.000000e+00 : f32
    %43 = vector.shape_cast %26 : vector<1x256xi1> to vector<1x256xi1>
    %44 = vector.broadcast %43 : vector<1x256xi1> to vector<2x256xi1>
    %45 = vector.broadcast %cst_12 : f32 to vector<2x256xf32>
    %46 = arith.select %44, %42, %45 : vector<2x256xi1>, vector<2x256xf32>
    %47 = arith.addf %1, %1 : vector<2x256xf32>
    %48 = arith.addf %41, %47 : vector<2x256xf32>
    %49 = arith.addf %48, %46 : vector<2x256xf32>
    %50 = arith.addf %31, %47 : vector<2x256xf32>
    %51 = arith.addf %50, %36 : vector<2x256xf32>
    %c255_i32_13 = arith.constant 255 : i32
    %52 = tpu.dynamic_rotate %49 by %c255_i32_13 dim 1 : vector<2x256xf32>, i32 -> vector<2x256xf32>
    %cst_14 = arith.constant 0.000000e+00 : f32
    %53 = vector.shape_cast %22 : vector<1x256xi1> to vector<1x256xi1>
    %54 = vector.broadcast %53 : vector<1x256xi1> to vector<2x256xi1>
    %55 = vector.broadcast %cst_14 : f32 to vector<2x256xf32>
    %56 = arith.select %54, %52, %55 : vector<2x256xi1>, vector<2x256xf32>
    %c1_i32_15 = arith.constant 1 : i32
    %57 = tpu.dynamic_rotate %49 by %c1_i32_15 dim 1 : vector<2x256xf32>, i32 -> vector<2x256xf32>
    %cst_16 = arith.constant 0.000000e+00 : f32
    %58 = vector.shape_cast %20 : vector<1x256xi1> to vector<1x256xi1>
    %59 = vector.broadcast %58 : vector<1x256xi1> to vector<2x256xi1>
    %60 = vector.broadcast %cst_16 : f32 to vector<2x256xf32>
    %61 = arith.select %59, %57, %60 : vector<2x256xi1>, vector<2x256xf32>
    %62 = arith.subf %56, %61 : vector<2x256xf32>
    %c16_i32_17 = arith.constant 16 : i32
    %63 = tpu.dynamic_rotate %51 by %c16_i32_17 dim 1 : vector<2x256xf32>, i32 -> vector<2x256xf32>
    %cst_18 = arith.constant 0.000000e+00 : f32
    %64 = vector.shape_cast %24 : vector<1x256xi1> to vector<1x256xi1>
    %65 = vector.broadcast %64 : vector<1x256xi1> to vector<2x256xi1>
    %66 = vector.broadcast %cst_18 : f32 to vector<2x256xf32>
    %67 = arith.select %65, %63, %66 : vector<2x256xi1>, vector<2x256xf32>
    %c240_i32_19 = arith.constant 240 : i32
    %68 = tpu.dynamic_rotate %51 by %c240_i32_19 dim 1 : vector<2x256xf32>, i32 -> vector<2x256xf32>
    %cst_20 = arith.constant 0.000000e+00 : f32
    %69 = vector.shape_cast %26 : vector<1x256xi1> to vector<1x256xi1>
    %70 = vector.broadcast %69 : vector<1x256xi1> to vector<2x256xi1>
    %71 = vector.broadcast %cst_20 : f32 to vector<2x256xf32>
    %72 = arith.select %70, %68, %71 : vector<2x256xi1>, vector<2x256xf32>
    %73 = arith.subf %67, %72 : vector<2x256xf32>
    %74 = math.absf %62 : vector<2x256xf32>
    %c0_21 = arith.constant 0 : index
    %c0_22 = arith.constant 0 : index
    %c0_23 = arith.constant 0 : index
    %75 = vector.load %arg2[%c0_21, %c0_22, %c0_23] : memref<1x2x256xf32, #tpu.memory_space<vmem>>, vector<1x2x256xf32>
    %76 = vector.shape_cast %75 : vector<1x2x256xf32> to vector<2x256xf32>
    %77 = vector.shape_cast %74 : vector<2x256xf32> to vector<1x2x256xf32>
    tpu.vector_store %arg2[%c0_21, %c0_22, %c0_23], %77 {strides = array<i32>} : memref<1x2x256xf32, #tpu.memory_space<vmem>>, vector<1x2x256xf32>,
    %78 = math.absf %73 : vector<2x256xf32>
    %c0_24 = arith.constant 0 : index
    %c0_25 = arith.constant 0 : index
    %c0_26 = arith.constant 0 : index
    %79 = vector.load %arg3[%c0_24, %c0_25, %c0_26] : memref<1x2x256xf32, #tpu.memory_space<vmem>>, vector<1x2x256xf32>
    %80 = vector.shape_cast %79 : vector<1x2x256xf32> to vector<2x256xf32>
    %81 = vector.shape_cast %78 : vector<2x256xf32> to vector<1x2x256xf32>
    tpu.vector_store %arg3[%c0_24, %c0_25, %c0_26], %81 {strides = array<i32>} : memref<1x2x256xf32, #tpu.memory_space<vmem>>, vector<1x2x256xf32>,
    return
  }
  func.func @transform_0(%arg0: i32) -> (i32, i32, i32) {
    %c0_i32 = arith.constant 0 : i32
    %c0_i32_0 = arith.constant 0 : i32
    %c0_i32_1 = arith.constant 0 : i32
    return %arg0, %c0_i32, %c0_i32_0 : i32, i32, i32
  }
  func.func @transform_1(%arg0: i32) -> (i32, i32, i32) {
    %c0_i32 = arith.constant 0 : i32
    %c0_i32_0 = arith.constant 0 : i32
    %c0_i32_1 = arith.constant 0 : i32
    return %arg0, %c0_i32, %c0_i32_0 : i32, i32, i32
  }
  func.func @transform_2(%arg0: i32) -> (i32, i32, i32) {
    %c0_i32 = arith.constant 0 : i32
    %c0_i32_0 = arith.constant 0 : i32
    %c0_i32_1 = arith.constant 0 : i32
    return %arg0, %c0_i32, %c0_i32_0 : i32, i32, i32
  }
}

</mosaic_0001>

<bundles_post_ra>
// kernel: tpu_custom_call.1
= control target key start
LH: loop header
LB: loop body
LE: loop exit
PB: predicated region body
PF: predicated region fallthrough
CT: control target
= control target key end

     0   :  { %8 = vsyncpa [#allocation3], 0  ;;  %s478_s0 = inlined_call_operand.hbm [shape: f32[1,2,256], index: 0, kind: input, shape index: {}]   ;;  %s479_s1 = inlined_call_operand.hbm [shape: f32[1,2,256], index: 1, kind: output, shape index: {0}]   ;;  %s480_s2 = inlined_call_operand.hbm [shape: f32[1,2,256], index: 2, kind: output, shape index: {1}]  }
   0x1   :  { %9 = vsyncpa [#allocation4], 0 }
   0x2   :  { %10 = vsyncpa [#allocation7], 0  ;;  %s318_s9 = smov [#allocation2]   ;;  %s246_s13 = scalar_lea.hbm %s478_s0, 64 }
   0x3   :  { %s17_s10 = sshll.u32 %s318_s9, 4  ;;  %p247_p0 = scmp.ne.s32.totalorder %s478_s0, %s246_s13  ;;  %s18_s10 = int_to_ptr.vmem [resolvable:$true] %s17_s10 }
   0x4   :  { %p250_p1 = scmp.lt.u32.totalorder %s246_s13, %s478_s0 }
   0x6   :  { %p252_p2 = pnand %p250_p1, %p247_p0 }
   0x8   :  { %255 = shalt.err (!%p252_p2)
}
   0x9   :  { %s256_s18 = scalar_lea.vmem %s18_s10, 64  ;;  %p261_p4 = scmp.lt.s32.totalorder %s18_s10, %s18_s10 }
   0xa   :  { %p257_p3 = scmp.ne.s32.totalorder %s18_s10, %s256_s18  ;;  %p262_p5 = scmp.lt.s32.totalorder %s256_s18, %s256_s18 }
   0xc   :  { %p263_p6 = por %p262_p5, %p261_p4 }
   0xe   :  { %p264_p7 = pnand %p263_p6, %p257_p3 }
  0x10   :  { %267 = shalt.err (!%p264_p7)
}
  0x11   :  { %20 = dma.hbm_to_vmem [thread:$0]  %s478_s0, 64, %s18_s10, [#allocation3]  }
  0x12   :  { %312 = dma.done.wait [#allocation3], 64  }
  0x13   :  { %313 = vsyncadd [#allocation3], 4294967232  ;;  %v25_v0 = vlaneseq  ;;  %v319_v1 = vmov 1983009808   ;;  %v24_v6 = vld [vmem:[#allocation2] sm:$0xf] }
  0x14   :  { %v62_v2 = vunpack.c.l.s4 %v319_v1  ;;  %v123_v8 = vadd.f32 %v24_v6, %v24_v6  ;;  %s320_s21 = smov 16   ;;  %s321_s22 = smov 1  }
  0x15   :  { %v65_v3 = vshrl.u32 %v25_v0, 7  ;;  %s322_s0 = smov 127   ;;  %s323_s23 = smov 112   ;;  %v361_v11 = vand.u32 127, %v25_v0 }
  0x16   :  { %v63_v4 = vunpack.c.0.s8 %v62_v2  ;;  %s324_s24 = smov [#allocation5]  }
  0x17   :  { %vm101_vm0 = vcmp.lt.s32.totalorder %v361_v11, 16  ;;  %v365_v16 = vadd.s32 128, %v361_v11  ;;  %vm56_vm1 = vcmp.ge.s32.totalorder %v361_v11, 16  ;;  %v32_v18 = vand.u32 15, %v361_v11  ;;  %s213_s25 = sshll.u32 %s324_s24, 4  ;;  %s214_s25 = int_to_ptr.vmem [resolvable:$true] %s213_s25 }
  0x18   :  { %v66_v5 = vsub.s32 %v63_v4, %v65_v3  ;;  %vm75_vm2 = vcmp.lt.s32.totalorder %v361_v11, 1  ;;  %vm114_vm3 = vcmp.lt.s32.totalorder %v361_v11, 112  ;;  %vm88_vm7 = vcmp.lt.s32.totalorder %v361_v11, 127  ;;  %s268_s26 = scalar_lea.vmem %s214_s25, 64  ;;  %p273_p9 = scmp.lt.s32.totalorder %s214_s25, %s214_s25 }
  0x19   :  { %v39_v19 = vand.u32 15, %v365_v16  ;;  %vm59_vm4 = vcmp.lt.s32.totalorder %v365_v16, 240  ;;  %vm379_vm5 = vcmp.ne.s32.totalorder %v32_v18, 0  ;;  %vm404_vm8 = vcmp.ne.s32.totalorder %v32_v18, 15  ;;  %p269_p8 = scmp.ne.s32.totalorder %s214_s25, %s268_s26  ;;  %p274_p10 = scmp.lt.s32.totalorder %s268_s26, %s268_s26 }
  0x1a   :  { %v67_v7 = vrot.slane %v24_v6, %v66_v5  ;;  %v131_v10 = vrot.slane %v123_v8, %v66_v5 }
  0x1b   :  { %vm383_vm6 = vcmp.ne.s32.totalorder %v39_v19, 0  ;;  %vm410_vm9 = vcmp.ne.s32.totalorder %v39_v19, 15  ;;  %p275_p11 = por %p274_p10, %p273_p9 }
  0x1c   :  { %97 = vrot.lane.b32.xlu1 %v67_v7, %s320_s21  ;;  %71 = vrot.lane.b32.xlu0 %v67_v7, %s321_s22  ;;  %v68_v9 = vcombine.high %v67_v7, %v67_v7  ;;  %v132_v22 = vcombine.high %v131_v10, %v131_v10 }
  0x1d   :  { %p276_p12 = pnand %p275_p11, %p269_p8 }
  0x20   :  { %84 = vrot.lane.b32.xlu0 %v67_v7, %s322_s0  ;;  %99 = vrot.lane.b32.xlu1 %v68_v9, %s320_s21 }
  0x24   :  { %86 = vrot.lane.b32.xlu1 %v68_v9, %s322_s0  ;;  %73 = vrot.lane.b32.xlu0 %v68_v9, %s321_s22 }
  0x28   :  { %112 = vrot.lane.b32.xlu1 %v68_v9, %s323_s23  ;;  %110 = vrot.lane.b32.xlu0 %v67_v7, %s323_s23 }
  0x8e   :  { %v98_v12 = vpop.permute.xlu1 %97  ;;  %v72_v13 = vpop.permute.xlu0 %71 }
  0x92   :  { %v85_v14 = vpop.permute.xlu0 %84  ;;  %v100_v15 = vpop.permute.xlu1 %99 }
  0x93   :  { %v103_v17 = vsel %vm101_vm0, %v100_v15, %v98_v12  ;;  %v102_v24 = vsel %vm101_vm0, %v98_v12, %v100_v15 }
  0x94   :  { %v108_v23 = vsel %vm56_vm1, %v103_v17, 0.0  ;;  %v136_v31 = vadd.f32 %v132_v22, %v102_v24 }
  0x95   :  { %v135_v25 = vadd.f32 %v131_v10, %v108_v23 }
  0x96   :  { %v87_v20 = vpop.permute.xlu1 %86  ;;  %v74_v21 = vpop.permute.xlu0 %73 }
  0x97   :  { %v77_v28 = vsel %vm75_vm2, %v74_v21, %v72_v13  ;;  %v76_v32 = vsel %vm75_vm2, %v72_v13, %v74_v21  ;;  %v89_v41 = vsel %vm88_vm7, %v85_v14, %v87_v20  ;;  %v90_v44 = vsel %vm88_vm7, %v87_v20, %v85_v14 }
  0x98   :  { %v82_v37 = vsel %vm379_vm5, %v77_v28, 0.0  ;;  %v83_v39 = vsel %vm383_vm6, %v76_v32, 0.0  ;;  %v95_v46 = vsel %vm404_vm8, %v89_v41, 0.0  ;;  %v96_v47 = vsel %vm410_vm9, %v90_v44, 0.0 }
  0x99   :  { %v139_v42 = vadd.f32 %v131_v10, %v82_v37  ;;  %v140_v45 = vadd.f32 %v132_v22, %v83_v39 }
  0x9a   :  { %v113_v29 = vpop.permute.xlu1 %112  ;;  %v111_v30 = vpop.permute.xlu0 %110 }
  0x9b   :  { %v115_v33 = vsel %vm114_vm3, %v111_v30, %v113_v29  ;;  %v116_v34 = vsel %vm114_vm3, %v113_v29, %v111_v30  ;;  %v141_v48 = vadd.f32 %v139_v42, %v95_v46  ;;  %v142_v49 = vadd.f32 %v140_v45, %v96_v47 }
  0x9c   :  { %v122_v35 = vsel %vm59_vm4, %v116_v34, 0.0  ;;  %v137_v36 = vadd.f32 %v135_v25, %v115_v33 }
  0x9d   :  { %v138_v38 = vadd.f32 %v136_v31, %v122_v35 }
  0x9e   :  { %143 = vrot.lane.b32.xlu0 %v137_v36, %s322_s0 }
  0x9f   :  { %145 = vrot.lane.b32.xlu1 %v138_v38, %s322_s0 }
  0xa2   :  { %151 = vrot.lane.b32.xlu0 %v137_v36, %s321_s22 }
  0xa3   :  { %153 = vrot.lane.b32.xlu1 %v138_v38, %s321_s22 }
  0xa6   :  { %161 = vrot.lane.b32.xlu0 %v141_v48, %s320_s21 }
  0xa7   :  { %163 = vrot.lane.b32.xlu1 %v142_v49, %s320_s21 }
  0xaa   :  { %169 = vrot.lane.b32.xlu0 %v141_v48, %s323_s23 }
  0xab   :  { %171 = vrot.lane.b32.xlu1 %v142_v49, %s323_s23 }
 0x110   :  { %v144_v50 = vpop.permute.xlu0 %143 }
 0x111   :  { %v146_v51 = vpop.permute.xlu1 %145 }
 0x112   :  { %v147_v52 = vsel %vm88_vm7, %v144_v50, %v146_v51  ;;  %v148_v53 = vsel %vm88_vm7, %v146_v51, %v144_v50 }
 0x113   :  { %v149_v58 = vsel %vm404_vm8, %v147_v52, 0.0  ;;  %v150_v59 = vsel %vm410_vm9, %v148_v53, 0.0 }
 0x114   :  { %v152_v54 = vpop.permute.xlu0 %151 }
 0x115   :  { %v154_v55 = vpop.permute.xlu1 %153 }
 0x116   :  { %v155_v56 = vsel %vm75_vm2, %v152_v54, %v154_v55  ;;  %v156_v57 = vsel %vm75_vm2, %v154_v55, %v152_v54 }
 0x117   :  { %v157_v60 = vsel %vm379_vm5, %v156_v57, 0.0  ;;  %v158_v61 = vsel %vm383_vm6, %v155_v56, 0.0 }
 0x118   :  { %v159_v62 = vsub.f32 %v149_v58, %v157_v60  ;;  %v160_v63 = vsub.f32 %v150_v59, %v158_v61  ;;  %v162_v0 = vpop.permute.xlu0 %161 }
 0x119   :  { %v164_v1 = vpop.permute.xlu1 %163 }
 0x11a   :  { %v179_v2 = vand.u32 2147483647, %v159_v62  ;;  %v180_v3 = vand.u32 2147483647, %v160_v63  ;;  %v166_v4 = vsel %vm101_vm0, %v164_v1, %v162_v0  ;;  %v165_v12 = vsel %vm101_vm0, %v162_v0, %v164_v1 }
 0x11b   :  { %v167_v8 = vsel %vm56_vm1, %v166_v4, 0.0 }
 0x11c   :  { %v170_v5 = vpop.permute.xlu0 %169  ;;  %v183_v6 = vcombine.low %v179_v2, %v180_v3 }
 0x11d   :  { %v172_v7 = vpop.permute.xlu1 %171 }
 0x11e   :  { %v173_v9 = vsel %vm114_vm3, %v170_v5, %v172_v7  ;;  %v174_v10 = vsel %vm114_vm3, %v172_v7, %v170_v5  ;;  %236 = vst.sshfl [vmem:[#allocation5] sm:$0x33 pattern:$0x76325410] %v183_v6 }
 0x11f   :  { %v176_v13 = vsel %vm59_vm4, %v174_v10, 0.0  ;;  %v177_v14 = vsub.f32 %v167_v8, %v173_v9 }
 0x120   :  { %279 = shalt.err (!%p276_p12)
}
 0x121   :  { %s280_s29 = scalar_lea.hbm %s479_s1, 64 }
 0x122   :  { %p281_p13 = scmp.ne.s32.totalorder %s479_s1, %s280_s29  ;;  %p284_p0 = scmp.lt.u32.totalorder %s280_s29, %s479_s1 }
 0x124   :  { %p286_p1 = pnand %p284_p0, %p281_p13 }
 0x126   :  { %289 = shalt.err (!%p286_p1)
}
 0x127   :  { %216 = dma.vmem_to_hbm [thread:$0]  %s214_s25, 64, %s479_s1, [#allocation4]   ;;  %v178_v11 = vsub.f32 %v165_v12, %v176_v13  ;;  %v193_v15 = vand.u32 2147483647, %v177_v14 }
 0x128   :  { %s325_s8 = smov [#allocation6]  }
 0x129   :  { %s223_s9 = sshll.u32 %s325_s8, 4  ;;  %v194_v16 = vand.u32 2147483647, %v178_v11  ;;  %s224_s9 = int_to_ptr.vmem [resolvable:$true] %s223_s9 }
 0x12a   :  { %s290_s10 = scalar_lea.vmem %s224_s9, 64  ;;  %p295_p3 = scmp.lt.s32.totalorder %s224_s9, %s224_s9 }
 0x12b   :  { %v197_v17 = vcombine.low %v193_v15, %v194_v16  ;;  %p291_p2 = scmp.ne.s32.totalorder %s224_s9, %s290_s10  ;;  %p296_p4 = scmp.lt.s32.totalorder %s290_s10, %s290_s10 }
 0x12d   :  { %237 = vst.sshfl [vmem:[#allocation6] sm:$0x33 pattern:$0x76325410] %v197_v17  ;;  %p297_p5 = por %p296_p4, %p295_p3 }
 0x12f   :  { %p298_p6 = pnand %p297_p5, %p291_p2 }
 0x131   :  { %301 = shalt.err (!%p298_p6)
}
 0x132   :  { %s302_s13 = scalar_lea.hbm %s480_s2, 64 }
 0x133   :  { %p303_p7 = scmp.ne.s32.totalorder %s480_s2, %s302_s13  ;;  %p306_p8 = scmp.lt.u32.totalorder %s302_s13, %s480_s2 }
 0x135   :  { %p308_p9 = pnand %p306_p8, %p303_p7 }
 0x137   :  { %311 = shalt.err (!%p308_p9)
}
 0x138   :  { %226 = dma.vmem_to_hbm [thread:$0]  %s224_s9, 64, %s480_s2, [#allocation7]  }
 0x139   :  { %314 = dma.done.wait [#allocation4], 64  }
 0x13a   :  { %315 = vsyncadd [#allocation4], 4294967232 }
 0x13b   :  { %316 = dma.done.wait [#allocation7], 64  }
 0x13c   :  { %317 = vsyncadd [#allocation7], 4294967232 }
 0x13d   :  { %233 = vsyncpa [#allocation3], 1 }
 0x13e   :  { %234 = vsyncpa [#allocation4], 1 }
 0x13f   :  { %235 = vsyncpa [#allocation7], 1 }

</bundles_post_ra>
